<compile_context>
chip_gen: v6e
topology: v6e:2x2x1
jax: 0.10.0
libtpu: 0.0.40
codegen_flags: <defaults>
</compile_context>

<pallas_src>
import functools

import jax
import jax.numpy as jnp
from jax.experimental import pallas as pl
from jax.experimental.pallas import tpu as pltpu

# Default sweetness ranges from the module's __init__ (name: (lo, hi, weight)).
SWEETNESS_RANGES = {
    "low": (8.0, 9.5, 1.2),
    "medium": (9.5, 11.0, 1.0),
    "high": (11.0, 13.0, 1.3),
}

_LANE = 128
_SUB = 8
_DEFAULT_BLOCK_ROWS = 8192            # 8192*128*4B = 4 MiB per f32 input block
_VMEM_LIMIT_BYTES = 48 * 1024 * 1024  # fits v5e scoped + v7x physical VMEM


def _round_up(x, m):
    return -(-x // m) * m


def _weighted_mse_kernel(pred_ref, targ_ref, out_ref, *,
                         ranges, rows, block_rows, n_inner):
    """Streaming weighted-squared-error partial sums (per-core accumulator)."""
    c = pl.program_id(0)   # core-split index ("parallel", 2 TCs on v7x)
    i = pl.program_id(1)   # streaming index  ("arbitrary")

    @pl.when(i == 0)
    def _():
        out_ref[...] = jnp.zeros_like(out_ref)

    p = pred_ref[...].astype(jnp.float32)
    t = targ_ref[...].astype(jnp.float32)
    sq = (p - t) * (p - t)

    # weights = ones; sequentially overwrite per range (matches the PyTorch
    # loop semantics: later ranges win on overlap).
    w = jnp.ones_like(sq)
    for (lo, hi, weight) in ranges:
        w = jnp.where((t >= jnp.float32(lo)) & (t < jnp.float32(hi)),
                      jnp.float32(weight), w)
    contrib = sq * w

    # Logical global block index (un-clamped); the index_map clamps the actual
    # DMA to the last real block, so overhang iterations load valid data that
    # this predicate/mask then zeroes out.
    g = c * n_inner + i
    is_full = (g + 1) * block_rows <= rows   # scalar: block entirely in-bounds

    @pl.when(is_full)
    def _():
        # Hot path: no masking work at all, just fold (br,128)->(8,128).
        out_ref[...] += jnp.sum(
            contrib.reshape(block_rows // _SUB, _SUB, _LANE), axis=0)

    @pl.when(jnp.logical_not(is_full))
    def _():
        # Cold path (at most one block per core): mask by row index only,
        # NaN-safe select so unspecified partial-block data cannot poison
        # the sum.  rem <= 0 for fully-overhanging blocks -> contributes 0.
        row = jax.lax.broadcasted_iota(jnp.int32, (block_rows, _LANE), 0)
        rem = rows - g * block_rows
        masked = jnp.where(row < rem, contrib, jnp.float32(0.0))
        out_ref[...] += jnp.sum(
            masked.reshape(block_rows // _SUB, _SUB, _LANE), axis=0)


def weighted_mse_loss(predictions, targets, sweetness_ranges=None,
                      block_rows=_DEFAULT_BLOCK_ROWS):
    """JAX/Pallas equivalent of WeightedMSELoss.forward."""
    if sweetness_ranges is None:
        sweetness_ranges = SWEETNESS_RANGES
    ranges = tuple(sweetness_ranges.values())

    # .squeeze() in torch removes all size-1 dims; F.mse_loss broadcasts.
    pred = jnp.squeeze(predictions)
    targ = jnp.squeeze(targets)
    bshape = jnp.broadcast_shapes(pred.shape, targ.shape)
    if pred.shape != bshape:
        pred = jnp.broadcast_to(pred, bshape)
    if targ.shape != bshape:
        targ = jnp.broadcast_to(targ, bshape)

    # Stream native 16/32-bit floats (no wrapper-side f32 upcast HBM pass);
    # any other dtype falls back to f32.
    def _canon(x):
        return x if x.dtype in (jnp.float32, jnp.bfloat16) else x.astype(jnp.float32)

    pred = _canon(pred).reshape(-1)
    targ = _canon(targ).reshape(-1)

    n = pred.shape[0]
    if n == 0:
        return jnp.float32(jnp.nan)   # torch .mean() over empty -> nan

    rows = -(-n // _LANE)  # ceil(n / 128)

    # Only pad the ragged tail (<= 127 elems) to reach a lane multiple; padded
    # zeros contribute exactly 0 (sq=0; t=0 falls in no range -> w=1).
    # TODO(synk): this pad is still a full extra HBM pass when it triggers.
    if n != rows * _LANE:
        pad = rows * _LANE - n
        pred = jnp.pad(pred, (0, pad))
        targ = jnp.pad(targ, (0, pad))
    pred2 = pred.reshape(rows, _LANE)
    targ2 = targ.reshape(rows, _LANE)

    # Sublane multiple for the block row dim: 8 for f32, 16 for bf16 (packed).
    min_itemsize = int(min(pred2.dtype.itemsize, targ2.dtype.itemsize))
    sub_mult = _SUB * max(1, 4 // min_itemsize)

    br = min(int(block_rows), _round_up(rows, sub_mult))
    br = max(_round_up(br, sub_mult), sub_mult)
    n_blocks = -(-rows // br)
    n_split = 2 if n_blocks >= 2 else 1   # 2 TensorCores on v7x; serial on v5e/v6e
    n_inner = -(-n_blocks // n_split)
    last_block = n_blocks - 1

    def in_map(c, i):
        # Clamp overhang iterations (odd block count on the 2-way split) to the
        # last real block; the kernel masks their contribution to zero.
        return (jnp.minimum(c * n_inner + i, last_block), 0)

    kernel = functools.partial(_weighted_mse_kernel, ranges=ranges, rows=rows,
                               block_rows=br, n_inner=n_inner)

    partials = pl.pallas_call(
        kernel,
        out_shape=jax.ShapeDtypeStruct((n_split * _SUB, _LANE), jnp.float32),
        grid=(n_split, n_inner),
        in_specs=[
            pl.BlockSpec((br, _LANE), in_map),
            pl.BlockSpec((br, _LANE), in_map),
        ],
        out_specs=pl.BlockSpec((_SUB, _LANE), lambda c, i: (c, 0)),
        compiler_params=pltpu.CompilerParams(
            dimension_semantics=("parallel", "arbitrary"),
            vmem_limit_bytes=_VMEM_LIMIT_BYTES),
    )(pred2, targ2)

    # Combine per-core (8,128) partials and take the mean over the n real
    # elements (tiny XLA reduction over <= 2048 floats).
    return jnp.sum(partials) / jnp.float32(n)


def _reference(predictions, targets, sweetness_ranges=None):
    """Plain-JAX reference of the PyTorch forward, for a sanity check."""
    if sweetness_ranges is None:
        sweetness_ranges = SWEETNESS_RANGES
    pred = jnp.squeeze(predictions).astype(jnp.float32)
    targ = jnp.squeeze(targets).astype(jnp.float32)
    sq = (pred - targ) ** 2
    w = jnp.ones_like(targ)
    for (lo, hi, weight) in sweetness_ranges.values():
        w = jnp.where((targ >= lo) & (targ < hi), jnp.float32(weight), w)
    return jnp.mean(sq * w)


if __name__ == "__main__":
    key = jax.random.PRNGKey(0)
    kp, kt = jax.random.split(key)

    batch = 64
    # Typical regression-head output (B, 1); targets (B,), sweetness in [8, 13).
    targets = jax.random.uniform(kt, (batch,), jnp.float32, 8.0, 13.0)
    predictions = (targets + 0.3 * jax.random.normal(kp, (batch,))).reshape(
        batch, 1)

    loss = jax.block_until_ready(weighted_mse_loss(predictions, targets))
    ref = _reference(predictions, targets)
    assert jnp.allclose(loss, ref, rtol=1e-5, atol=1e-6), (loss, ref)

    # Ragged-tail / partial-block mask path.
    n2 = 300
    k2p, k2t = jax.random.split(jax.random.PRNGKey(1))
    t2 = jax.random.uniform(k2t, (n2,), jnp.float32, 8.0, 13.0)
    p2 = (t2 + 0.3 * jax.random.normal(k2p, (n2,))).reshape(n2, 1)
    loss2 = jax.block_until_ready(weighted_mse_loss(p2, t2))
    ref2 = _reference(p2, t2)
    assert jnp.allclose(loss2, ref2, rtol=1e-5, atol=1e-6), (loss2, ref2)

    # Native bf16 streaming path (no wrapper upcast), lane-exact length.
    n3 = 256
    k3p, k3t = jax.random.split(jax.random.PRNGKey(2))
    t3 = jax.random.uniform(k3t, (n3,), jnp.float32, 8.0, 13.0).astype(jnp.bfloat16)
    p3 = (t3.astype(jnp.float32)
          + 0.3 * jax.random.normal(k3p, (n3,))).astype(jnp.bfloat16)
    loss3 = jax.block_until_ready(weighted_mse_loss(p3, t3))
    ref3 = _reference(p3, t3)
    assert jnp.allclose(loss3, ref3, rtol=2e-2, atol=1e-3), (loss3, ref3)

    print("KERNEL_OK")
</pallas_src>

<mosaic_0001>
module attributes {stable_mosaic.version = 11 : i64} {
  func.func @_weighted_mse_kernel(%arg0: i32, %arg1: i32, %arg2: memref<8x128xf32, #tpu.memory_space<vmem>>, %arg3: memref<8x128xf32, #tpu.memory_space<vmem>>, %arg4: memref<8x128xf32, #tpu.memory_space<vmem>>) attributes {dimension_semantics = [#tpu.dimension_semantics<parallel>, #tpu.dimension_semantics<arbitrary>], iteration_bounds = array<i64: 1, 1>, scalar_prefetch = 0 : i64, scratch_operands = 0 : i64, tpu.core_type = #tpu.core_type<tc>, window_params = [{transform_indices = @transform_0, window_bounds = array<i64: 8, 128>}, {transform_indices = @transform_1, window_bounds = array<i64: 8, 128>}, {transform_indices = @transform_2, window_bounds = array<i64: 8, 128>}]} {
    %c0_i32 = arith.constant 0 : i32
    %0 = arith.cmpi eq, %arg1, %c0_i32 : i32
    %1 = arith.extui %0 : i1 to i32
    %c0_i32_0 = arith.constant 0 : i32
    %2 = arith.cmpi ne, %1, %c0_i32_0 : i32
    scf.if %2 {
      %cst_17 = arith.constant 0.000000e+00 : f32
      %41 = vector.broadcast %cst_17 : f32 to vector<8x128xf32>
      %c0_18 = arith.constant 0 : index
      %c0_19 = arith.constant 0 : index
      %42 = vector.load %arg4[%c0_18, %c0_19] : memref<8x128xf32, #tpu.memory_space<vmem>>, vector<8x128xf32>
      tpu.vector_store %arg4[%c0_18, %c0_19], %41 {strides = array<i32>} : memref<8x128xf32, #tpu.memory_space<vmem>>, vector<8x128xf32>,
    } else {
    }
    %c0 = arith.constant 0 : index
    %c0_1 = arith.constant 0 : index
    %3 = vector.load %arg2[%c0, %c0_1] : memref<8x128xf32, #tpu.memory_space<vmem>>, vector<8x128xf32>
    %c0_2 = arith.constant 0 : index
    %c0_3 = arith.constant 0 : index
    %4 = vector.load %arg3[%c0_2, %c0_3] : memref<8x128xf32, #tpu.memory_space<vmem>>, vector<8x128xf32>
    %5 = arith.subf %3, %4 : vector<8x128xf32>
    %6 = arith.subf %3, %4 : vector<8x128xf32>
    %7 = arith.mulf %5, %6 : vector<8x128xf32>
    %cst = arith.constant 1.000000e+00 : f32
    %8 = vector.broadcast %cst : f32 to vector<8x128xf32>
    %cst_4 = arith.constant 8.000000e+00 : f32
    %9 = vector.broadcast %cst_4 : f32 to vector<8x128xf32>
    %10 = arith.cmpf oge, %4, %9 : vector<8x128xf32>
    %cst_5 = arith.constant 9.500000e+00 : f32
    %11 = vector.broadcast %cst_5 : f32 to vector<8x128xf32>
    %12 = arith.cmpf olt, %4, %11 : vector<8x128xf32>
    %13 = arith.andi %10, %12 : vector<8x128xi1>
    %cst_6 = arith.constant 1.200000e+00 : f32
    %14 = vector.broadcast %cst_6 : f32 to vector<8x128xf32>
    %15 = arith.select %13, %14, %8 : vector<8x128xi1>, vector<8x128xf32>
    %cst_7 = arith.constant 9.500000e+00 : f32
    %16 = vector.broadcast %cst_7 : f32 to vector<8x128xf32>
    %17 = arith.cmpf oge, %4, %16 : vector<8x128xf32>
    %cst_8 = arith.constant 1.100000e+01 : f32
    %18 = vector.broadcast %cst_8 : f32 to vector<8x128xf32>
    %19 = arith.cmpf olt, %4, %18 : vector<8x128xf32>
    %20 = arith.andi %17, %19 : vector<8x128xi1>
    %cst_9 = arith.constant 1.000000e+00 : f32
    %21 = vector.broadcast %cst_9 : f32 to vector<8x128xf32>
    %22 = arith.select %20, %21, %15 : vector<8x128xi1>, vector<8x128xf32>
    %cst_10 = arith.constant 1.100000e+01 : f32
    %23 = vector.broadcast %cst_10 : f32 to vector<8x128xf32>
    %24 = arith.cmpf oge, %4, %23 : vector<8x128xf32>
    %cst_11 = arith.constant 1.300000e+01 : f32
    %25 = vector.broadcast %cst_11 : f32 to vector<8x128xf32>
    %26 = arith.cmpf olt, %4, %25 : vector<8x128xf32>
    %27 = arith.andi %24, %26 : vector<8x128xi1>
    %cst_12 = arith.constant 1.300000e+00 : f32
    %28 = vector.broadcast %cst_12 : f32 to vector<8x128xf32>
    %29 = arith.select %27, %28, %22 : vector<8x128xi1>, vector<8x128xf32>
    %30 = arith.mulf %7, %29 : vector<8x128xf32>
    %c1_i32 = arith.constant 1 : i32
    %31 = arith.muli %arg0, %c1_i32 : i32
    %32 = arith.addi %31, %arg1 : i32
    %c1_i32_13 = arith.constant 1 : i32
    %33 = arith.addi %32, %c1_i32_13 : i32
    %c8_i32 = arith.constant 8 : i32
    %34 = arith.muli %33, %c8_i32 : i32
    %c1_i32_14 = arith.constant 1 : i32
    %35 = arith.cmpi sle, %34, %c1_i32_14 : i32
    %36 = arith.extui %35 : i1 to i32
    %c0_i32_15 = arith.constant 0 : i32
    %37 = arith.cmpi ne, %36, %c0_i32_15 : i32
    scf.if %37 {
      %c0_17 = arith.constant 0 : index
      %c0_18 = arith.constant 0 : index
      %41 = vector.load %arg4[%c0_17, %c0_18] : memref<8x128xf32, #tpu.memory_space<vmem>>, vector<8x128xf32>
      %42 = vector.shape_cast %30 : vector<8x128xf32> to vector<1x8x128xf32>
      %cst_19 = arith.constant dense<0.000000e+00> : vector<8x128xf32>
      %43 = vector.multi_reduction <add>, %42, %cst_19 [0] : vector<1x8x128xf32> to vector<8x128xf32>
      %44 = arith.addf %41, %43 : vector<8x128xf32>
      %c0_20 = arith.constant 0 : index
      %c0_21 = arith.constant 0 : index
      %45 = vector.load %arg4[%c0_20, %c0_21] : memref<8x128xf32, #tpu.memory_space<vmem>>, vector<8x128xf32>
      tpu.vector_store %arg4[%c0_20, %c0_21], %44 {strides = array<i32>} : memref<8x128xf32, #tpu.memory_space<vmem>>, vector<8x128xf32>,
    } else {
    }
    %true = arith.constant true
    %38 = arith.xori %35, %true : i1
    %39 = arith.extui %38 : i1 to i32
    %c0_i32_16 = arith.constant 0 : i32
    %40 = arith.cmpi ne, %39, %c0_i32_16 : i32
    scf.if %40 {
      %41 = tpu.iota {dimensions = array<i32: 0>} : vector<8x128xi32>
      %c8_i32_17 = arith.constant 8 : i32
      %42 = arith.muli %32, %c8_i32_17 : i32
      %c1_i32_18 = arith.constant 1 : i32
      %43 = arith.subi %c1_i32_18, %42 : i32
      %44 = vector.broadcast %43 : i32 to vector<8x128xi32>
      %45 = arith.cmpi slt, %41, %44 : vector<8x128xi32>
      %cst_19 = arith.constant 0.000000e+00 : f32
      %46 = vector.broadcast %cst_19 : f32 to vector<8x128xf32>
      %47 = arith.select %45, %30, %46 : vector<8x128xi1>, vector<8x128xf32>
      %c0_20 = arith.constant 0 : index
      %c0_21 = arith.constant 0 : index
      %48 = vector.load %arg4[%c0_20, %c0_21] : memref<8x128xf32, #tpu.memory_space<vmem>>, vector<8x128xf32>
      %49 = vector.shape_cast %47 : vector<8x128xf32> to vector<1x8x128xf32>
      %cst_22 = arith.constant dense<0.000000e+00> : vector<8x128xf32>
      %50 = vector.multi_reduction <add>, %49, %cst_22 [0] : vector<1x8x128xf32> to vector<8x128xf32>
      %51 = arith.addf %48, %50 : vector<8x128xf32>
      %c0_23 = arith.constant 0 : index
      %c0_24 = arith.constant 0 : index
      %52 = vector.load %arg4[%c0_23, %c0_24] : memref<8x128xf32, #tpu.memory_space<vmem>>, vector<8x128xf32>
      tpu.vector_store %arg4[%c0_23, %c0_24], %51 {strides = array<i32>} : memref<8x128xf32, #tpu.memory_space<vmem>>, vector<8x128xf32>,
    } else {
    }
    return
  }
  func.func @transform_0(%arg0: i32, %arg1: i32) -> (i32, i32) {
    %c1_i32 = arith.constant 1 : i32
    %0 = arith.muli %arg0, %c1_i32 : i32
    %1 = arith.addi %0, %arg1 : i32
    %c0_i32 = arith.constant 0 : i32
    %2 = arith.minsi %1, %c0_i32 : i32
    %c0_i32_0 = arith.constant 0 : i32
    %c0_i32_1 = arith.constant 0 : i32
    return %2, %c0_i32_0 : i32, i32
  }
  func.func @transform_1(%arg0: i32, %arg1: i32) -> (i32, i32) {
    %c1_i32 = arith.constant 1 : i32
    %0 = arith.muli %arg0, %c1_i32 : i32
    %1 = arith.addi %0, %arg1 : i32
    %c0_i32 = arith.constant 0 : i32
    %2 = arith.minsi %1, %c0_i32 : i32
    %c0_i32_0 = arith.constant 0 : i32
    %c0_i32_1 = arith.constant 0 : i32
    return %2, %c0_i32_0 : i32, i32
  }
  func.func @transform_2(%arg0: i32, %arg1: i32) -> (i32, i32) {
    %c0_i32 = arith.constant 0 : i32
    %c0_i32_0 = arith.constant 0 : i32
    return %arg0, %c0_i32 : i32, i32
  }
}

</mosaic_0001>

<bundles_post_ra>
// kernel: tpu_custom_call.1
= control target key start
LH: loop header
LB: loop body
LE: loop exit
PB: predicated region body
PF: predicated region fallthrough
CT: control target
= control target key end

     0   :  { %7 = vsyncpa [#allocation3], 0  ;;  %s227_s0 = inlined_call_operand.hbm [shape: f32[1,128], index: 0, kind: input, shape index: {}]   ;;  %s228_s1 = inlined_call_operand.vmem [shape: f32[1,128], index: 1, kind: input, shape index: {}]   ;;  %s229_s2 = inlined_call_operand.hbm [shape: f32[8,128], index: 2, kind: output, shape index: {}]  }
   0x1   :  { %8 = vsyncpa [#allocation4], 0 }
   0x2   :  { %19 = vsyncadd [#allocation3], 112  ;;  %s198_s9 = smov [#allocation2]  }
   0x3   :  { %s23_s10 = sshll.u32 %s198_s9, 4  ;;  %s24_s10 = int_to_ptr.vmem [resolvable:$true] %s23_s10 }
   0x4   :  { %s162_s11 = scalar_lea.vmem %s24_s10, 16  ;;  %s166_s12 = scalar_lea.vmem %s24_s10, 128 }
   0x5   :  { %p163_p0 = scmp.ne.s32.totalorder %s24_s10, %s162_s11  ;;  %p167_p1 = scmp.lt.s32.totalorder %s24_s10, %s24_s10 }
   0x6   :  { %p168_p2 = scmp.lt.s32.totalorder %s166_s12, %s162_s11 }
   0x8   :  { %p169_p3 = por %p168_p2, %p167_p1 }
   0xa   :  { %p170_p4 = pnand %p169_p3, %p163_p0 }
   0xc   :  { %173 = shalt.err (!%p170_p4)
}
   0xd   :  { %s199_s13 = smov 16   ;;  %s200_s14 = smov 1  }
   0xe   :  { %29 = dma.hbm_to_vmem [thread:$0]  %s227_s0, 16, %s24_s10, [#allocation3], %s199_s13, %s199_s13, %s200_s14  }
   0xf   :  { %194 = dma.done.wait [#allocation3], 128  }
  0x10   :  { %195 = vsyncadd [#allocation3], 4294967168  ;;  %v117_v0 = vlaneseq  ;;  %v85_v1 = vld [vmem:[#allocation2] sm:$0xff]  ;;  %v201_v6 = vmov 1.0   ;;  %s202_s0 = smov [#allocation5]  }
  0x11   :  { %v86_v2 = vld [vmem:[%s228_s1] sm:$0xff]  ;;  %s134_s1 = sshll.u32 %s202_s0, 4  ;;  %s135_s1 = int_to_ptr.vmem [resolvable:$true] %s134_s1 }
  0x12   :  { %v118_v3 = vshrl.u32 %v117_v0, 7  ;;  %v87_v4 = vsub.f32 %v85_v1, %v86_v2  ;;  %vm89_vm0 = vcmp.ge.f32.partialorder %v86_v2, 8.0  ;;  %vm90_vm1 = vcmp.lt.f32.partialorder %v86_v2, 9.5  ;;  %s174_s19 = scalar_lea.vmem %s135_s1, 128  ;;  %p179_p6 = scmp.lt.s32.totalorder %s135_s1, %s135_s1 }
  0x13   :  { %vm93_vm2 = vcmp.ge.f32.partialorder %v86_v2, 9.5  ;;  %vm91_vm3 = vmand %vm89_vm0, %vm90_vm1  ;;  %vm94_vm4 = vcmp.lt.f32.partialorder %v86_v2, 11.0  ;;  %vm97_vm5 = vcmp.ge.f32.partialorder %v86_v2, 11.0  ;;  %vm98_vm6 = vcmp.lt.f32.partialorder %v86_v2, 13.0  ;;  %p175_p5 = scmp.ne.s32.totalorder %s135_s1, %s174_s19  ;;  %p180_p7 = scmp.lt.s32.totalorder %s174_s19, %s174_s19 }
  0x14   :  { %v88_v5 = vmul.f32 %v87_v4, %v87_v4  ;;  %v92_v7 = vsel %vm91_vm3, 1.2, %v201_v6  ;;  %vm95_vm7 = vmand %vm93_vm2, %vm94_vm4  ;;  %vm122_vm9 = vcmp.lt.s32.totalorder %v118_v3, 1 }
  0x15   :  { %v96_v8 = vsel %vm95_vm7, 1.0, %v92_v7  ;;  %vm99_vm8 = vmand %vm97_vm5, %vm98_vm6  ;;  %p181_p8 = por %p180_p7, %p179_p6 }
  0x16   :  { %v100_v9 = vsel %vm99_vm8, 1.3, %v96_v8 }
  0x17   :  { %v101_v10 = vmul.f32 %v100_v9, %v88_v5  ;;  %p182_p9 = pnand %p181_p8, %p175_p5 }
  0x19   :  { %v123_v11 = vsel %vm122_vm9, %v101_v10, 0.0 }
  0x1a   :  { %127 = vst [vmem:[#allocation5] sm:$0xff] %v123_v11 }
  0x1b   :  { %185 = shalt.err (!%p182_p9)
}
  0x1c   :  { %137 = dma.vmem_to_hbm [thread:$0]  %s135_s1, 128, %s229_s2, [#allocation4]  }
  0x1d   :  { %196 = dma.done.wait [#allocation4], 128  }
  0x1e   :  { %197 = vsyncadd [#allocation4], 4294967168 }
  0x1f   :  { %141 = vsyncpa [#allocation3], 1 }
  0x20   :  { %142 = vsyncpa [#allocation4], 1 }

</bundles_post_ra>
